<compile_context>
chip_gen: v6e
topology: v6e:2x2x1
jax: 0.10.0
libtpu: 0.0.40
codegen_flags: <defaults>
</compile_context>

<pallas_src>
import math

import jax
import jax.numpy as jnp
from jax.experimental import pallas as pl
from jax.experimental.pallas import tpu as pltpu


def _upsample_nearest_kernel(x_ref, o_ref):
    """x_ref: (1, c_blk, H, W) block; o_ref: (1, c_blk, H_out, W_out) block."""
    x = x_ref[0]                                     # (c_blk, H, W)
    c_blk, H, W = x.shape
    H_out, W_out = o_ref.shape[2], o_ref.shape[3]
    dt = x.dtype

    # 0/1 column-selection matrix R[w, j] = 1  iff  floor(j*W/W_out) == w,
    # written division-free:  w*W_out <= j*W < (w+1)*W_out.
    jW = jax.lax.broadcasted_iota(jnp.int32, (W, W_out), 1) * W         # j*W
    wlo = jax.lax.broadcasted_iota(jnp.int32, (W, W_out), 0) * W_out    # w*W_out
    R = ((wlo <= jW) & (jW < wlo + W_out)).astype(dt)                   # (W, W_out)

    # 0/1 row-selection matrix L[i, h] = 1  iff  floor(i*H/H_out) == h.
    iH = jax.lax.broadcasted_iota(jnp.int32, (H_out, H), 0) * H         # i*H
    hlo = jax.lax.broadcasted_iota(jnp.int32, (H_out, H), 1) * H_out    # h*H_out
    L = ((hlo <= iH) & (iH < hlo + H_out)).astype(dt)                   # (H_out, H)

    # Lane (W) replication on the MXU: (c, H, W) @ (c, W, W_out) -> (c, H, W_out).
    Rb = jnp.broadcast_to(R[None], (c_blk, W, W_out))
    xw = jax.lax.dot_general(
        x, Rb,
        dimension_numbers=(((2,), (1,)), ((0,), (0,))),
        preferred_element_type=jnp.float32,
    ).astype(dt)                                     # (c_blk, H, W_out)

    # Sublane (H) replication on the MXU: (c, H_out, H) @ (c, H, W_out).
    Lb = jnp.broadcast_to(L[None], (c_blk, H_out, H))
    out = jax.lax.dot_general(
        Lb, xw,
        dimension_numbers=(((2,), (1,)), ((0,), (0,))),
        preferred_element_type=jnp.float32,
    )                                                # (c_blk, H_out, W_out) f32
    o_ref[0] = out.astype(o_ref.dtype)


def _resolve_output_size(H, W, size, scale_factor):
    """Mirror F.interpolate's output-size computation for 4D input."""
    if size is not None:
        if isinstance(size, (tuple, list)):
            return int(size[0]), int(size[1])
        return int(size), int(size)
    if scale_factor is None:
        raise ValueError("either size or scale_factor must be specified")
    if isinstance(scale_factor, (tuple, list)):
        sh, sw = float(scale_factor[0]), float(scale_factor[1])
    else:
        sh = sw = float(scale_factor)
    return int(math.floor(H * sh)), int(math.floor(W * sw))


def upsampling_layer(x, size=None, scale_factor=None, mode="nearest",
                     align_corners=None):
    """Pallas TPU implementation of UpsamplingLayer.forward for NCHW input."""
    if mode != "nearest":
        # TODO(synk): bilinear/bicubic/linear/area modes (and align_corners) are not
        # implemented; only the module's default mode='nearest' is supported.
        raise NotImplementedError(f"mode={mode!r} not implemented (only 'nearest')")
    if x.ndim != 4:
        # TODO(synk): 3D (NCL) / 5D (NCDHW) interpolate not implemented.
        raise NotImplementedError("only 4D NCHW input is supported")

    B, C, H, W = x.shape
    H_out, W_out = _resolve_output_size(H, W, size, scale_factor)
    itemsize = x.dtype.itemsize

    def _pad(r, c):  # VMEM footprint (elements) of an (r, c) tile, (8,128)-padded
        return ((r + 7) // 8) * 8 * ((c + 127) // 128) * 128

    def _vmem_need(cb):
        in_blk = cb * _pad(H, W) * itemsize
        out_blk = cb * _pad(H_out, W_out) * itemsize
        sel = cb * (_pad(W, W_out) + _pad(H_out, H)) * itemsize
        inter = cb * (_pad(H, W_out) + _pad(H_out, W_out)) * 4
        return 2 * in_blk + 2 * out_blk + sel + inter   # double-buffered I/O + temps

    budget = 40 * 1024 * 1024  # stay well under v7x's 64 MiB physical VMEM per TC
    c_blk = 1
    for d in range(1, C + 1):
        if C % d == 0 and _vmem_need(d) <= budget:
            c_blk = d

    need = _vmem_need(c_blk)
    vmem_limit = int(min(max(2 * need, 32 * 1024 * 1024), 64 * 1024 * 1024))
    if need > vmem_limit:  # degenerate huge-shape fallback
        vmem_limit = int(min(need + need // 4, 127 * 1024 * 1024))

    out = pl.pallas_call(
        _upsample_nearest_kernel,
        out_shape=jax.ShapeDtypeStruct((B, C, H_out, W_out), x.dtype),
        grid_spec=pltpu.PrefetchScalarGridSpec(
            num_scalar_prefetch=0,
            grid=(B, C // c_blk),
            in_specs=[
                pl.BlockSpec((1, c_blk, H, W), lambda b, c: (b, c, 0, 0)),
            ],
            out_specs=pl.BlockSpec((1, c_blk, H_out, W_out),
                                   lambda b, c: (b, c, 0, 0)),
        ),
        compiler_params=pltpu.CompilerParams(
            dimension_semantics=("parallel", "parallel"),
            vmem_limit_bytes=vmem_limit,
        ),
    )(x)
    return out


def upsample_nearest_ref(x, size=None, scale_factor=None):
    """Pure-JAX reference mirroring F.interpolate(..., mode='nearest')."""
    B, C, H, W = x.shape
    H_out, W_out = _resolve_output_size(H, W, size, scale_factor)
    hi = (jnp.arange(H_out) * H) // H_out
    wi = (jnp.arange(W_out) * W) // W_out
    return x[:, :, hi, :][:, :, :, wi]


if __name__ == "__main__":
    key = jax.random.PRNGKey(0)
    B, C, H, W = 2, 4, 16, 16
    x = jax.random.normal(key, (B, C, H, W), dtype=jnp.float32)

    # Typical module usage: UpsamplingLayer(scale_factor=2) with default mode='nearest'.
    out = upsampling_layer(x, scale_factor=2)
    out = jax.block_until_ready(out)
    ref = upsample_nearest_ref(x, scale_factor=2)
    assert out.shape == (B, C, 32, 32)
    assert jnp.allclose(out, ref, atol=1e-6, rtol=1e-6)

    # Arbitrary target size (non-integer effective scale) goes through the same path.
    out2 = jax.block_until_ready(upsampling_layer(x, size=(24, 40)))
    ref2 = upsample_nearest_ref(x, size=(24, 40))
    assert out2.shape == (B, C, 24, 40)
    assert jnp.allclose(out2, ref2, atol=1e-6, rtol=1e-6)

    print("KERNEL_OK")
</pallas_src>

<mosaic_0001>
module attributes {stable_mosaic.version = 11 : i64} {
  func.func @_upsample_nearest_kernel(%arg0: i32, %arg1: i32, %arg2: memref<1x4x16x16xf32, #tpu.memory_space<vmem>>, %arg3: memref<1x4x32x32xf32, #tpu.memory_space<vmem>>) attributes {dimension_semantics = [#tpu.dimension_semantics<parallel>, #tpu.dimension_semantics<parallel>], iteration_bounds = array<i64: 2, 1>, scalar_prefetch = 0 : i64, scratch_operands = 0 : i64, tpu.core_type = #tpu.core_type<tc>, window_params = [{transform_indices = @transform_0, window_bounds = array<i64: 1, 4, 16, 16>}, {transform_indices = @transform_1, window_bounds = array<i64: 1, 4, 32, 32>}]} {
    %c0 = arith.constant 0 : index
    %c0_0 = arith.constant 0 : index
    %c0_1 = arith.constant 0 : index
    %c0_2 = arith.constant 0 : index
    %0 = vector.load %arg2[%c0, %c0_0, %c0_1, %c0_2] : memref<1x4x16x16xf32, #tpu.memory_space<vmem>>, vector<1x4x16x16xf32>
    %1 = vector.shape_cast %0 : vector<1x4x16x16xf32> to vector<4x16x16xf32>
    %2 = tpu.iota {dimensions = array<i32: 1>} : vector<16x32xi32>
    %c16_i32 = arith.constant 16 : i32
    %3 = vector.broadcast %c16_i32 : i32 to vector<16x32xi32>
    %4 = arith.muli %2, %3 : vector<16x32xi32>
    %5 = tpu.iota {dimensions = array<i32: 0>} : vector<16x32xi32>
    %c32_i32 = arith.constant 32 : i32
    %6 = vector.broadcast %c32_i32 : i32 to vector<16x32xi32>
    %7 = arith.muli %5, %6 : vector<16x32xi32>
    %8 = arith.cmpi sle, %7, %4 : vector<16x32xi32>
    %c32_i32_3 = arith.constant 32 : i32
    %9 = vector.broadcast %c32_i32_3 : i32 to vector<16x32xi32>
    %10 = arith.addi %7, %9 : vector<16x32xi32>
    %11 = arith.cmpi slt, %4, %10 : vector<16x32xi32>
    %12 = arith.andi %8, %11 : vector<16x32xi1>
    %13 = arith.extui %12 : vector<16x32xi1> to vector<16x32xi32>
    %14 = arith.sitofp %13 : vector<16x32xi32> to vector<16x32xf32>
    %15 = tpu.iota {dimensions = array<i32: 0>} : vector<32x16xi32>
    %c16_i32_4 = arith.constant 16 : i32
    %16 = vector.broadcast %c16_i32_4 : i32 to vector<32x16xi32>
    %17 = arith.muli %15, %16 : vector<32x16xi32>
    %18 = tpu.iota {dimensions = array<i32: 1>} : vector<32x16xi32>
    %c32_i32_5 = arith.constant 32 : i32
    %19 = vector.broadcast %c32_i32_5 : i32 to vector<32x16xi32>
    %20 = arith.muli %18, %19 : vector<32x16xi32>
    %21 = arith.cmpi sle, %20, %17 : vector<32x16xi32>
    %c32_i32_6 = arith.constant 32 : i32
    %22 = vector.broadcast %c32_i32_6 : i32 to vector<32x16xi32>
    %23 = arith.addi %20, %22 : vector<32x16xi32>
    %24 = arith.cmpi slt, %17, %23 : vector<32x16xi32>
    %25 = arith.andi %21, %24 : vector<32x16xi1>
    %26 = arith.extui %25 : vector<32x16xi1> to vector<32x16xi32>
    %27 = arith.sitofp %26 : vector<32x16xi32> to vector<32x16xf32>
    %28 = vector.shape_cast %14 : vector<16x32xf32> to vector<1x16x32xf32>
    %29 = vector.shape_cast %28 : vector<1x16x32xf32> to vector<1x16x32xf32>
    %30 = vector.broadcast %29 : vector<1x16x32xf32> to vector<4x16x32xf32>
    %cst = arith.constant dense<0.000000e+00> : vector<4x16x32xf32>
    %31 = tpu.matmul %1, %30, %cst {dimension_numbers = #tpu.dot_dimension_numbers<[2], [1], [1], [2], [0, 0, 0, 1, 1, 2], [0], [0]>} : vector<4x16x16xf32>, vector<4x16x32xf32>, vector<4x16x32xf32> -> vector<4x16x32xf32>
    %32 = vector.shape_cast %27 : vector<32x16xf32> to vector<1x32x16xf32>
    %33 = vector.shape_cast %32 : vector<1x32x16xf32> to vector<1x32x16xf32>
    %34 = vector.broadcast %33 : vector<1x32x16xf32> to vector<4x32x16xf32>
    %cst_7 = arith.constant dense<0.000000e+00> : vector<4x32x32xf32>
    %35 = tpu.matmul %34, %31, %cst_7 {dimension_numbers = #tpu.dot_dimension_numbers<[2], [1], [1], [2], [0, 0, 0, 1, 1, 2], [0], [0]>} : vector<4x32x16xf32>, vector<4x16x32xf32>, vector<4x32x32xf32> -> vector<4x32x32xf32>
    %c0_8 = arith.constant 0 : index
    %c0_9 = arith.constant 0 : index
    %c0_10 = arith.constant 0 : index
    %c0_11 = arith.constant 0 : index
    %36 = vector.load %arg3[%c0_8, %c0_9, %c0_10, %c0_11] : memref<1x4x32x32xf32, #tpu.memory_space<vmem>>, vector<1x4x32x32xf32>
    %37 = vector.shape_cast %36 : vector<1x4x32x32xf32> to vector<4x32x32xf32>
    %38 = vector.shape_cast %35 : vector<4x32x32xf32> to vector<1x4x32x32xf32>
    tpu.vector_store %arg3[%c0_8, %c0_9, %c0_10, %c0_11], %38 {strides = array<i32>} : memref<1x4x32x32xf32, #tpu.memory_space<vmem>>, vector<1x4x32x32xf32>,
    return
  }
  func.func @transform_0(%arg0: i32, %arg1: i32) -> (i32, i32, i32, i32) {
    %c0_i32 = arith.constant 0 : i32
    %c0_i32_0 = arith.constant 0 : i32
    %c0_i32_1 = arith.constant 0 : i32
    return %arg0, %arg1, %c0_i32, %c0_i32_0 : i32, i32, i32, i32
  }
  func.func @transform_1(%arg0: i32, %arg1: i32) -> (i32, i32, i32, i32) {
    %c0_i32 = arith.constant 0 : i32
    %c0_i32_0 = arith.constant 0 : i32
    %c0_i32_1 = arith.constant 0 : i32
    return %arg0, %arg1, %c0_i32, %c0_i32_0 : i32, i32, i32, i32
  }
}

</mosaic_0001>

<bundles_post_ra>
// kernel: tpu_custom_call.1
= control target key start
LH: loop header
LB: loop body
LE: loop exit
PB: predicated region body
PF: predicated region fallthrough
CT: control target
= control target key end

     0   :  { %6 = vsyncpa [#allocation3], 0  ;;  %s1625_s0 = inlined_call_operand.hbm [shape: f32[2,4,16,16], index: 0, kind: input, shape index: {}]   ;;  %s1626_s1 = inlined_call_operand.hbm [shape: f32[2,4,32,32], index: 1, kind: output, shape index: {}]  }
   0x1   :  { %8 = vsyncpa [#allocation3 + $0x1], 0 }
   0x2   :  { %9 = vsyncpa [#allocation4], 0 }
   0x3   :  { %11 = vsyncpa [#allocation4 + $0x1], 0  ;;  %s1369_s6 = smov 0   ;;  %s1371_s7 = smov 0  }
   0x4   :  { %s1373_s8 = smov 0   ;;  %s1375_s9 = smov 0  }
   0x5   :  { %s1377_s10 = smov 0   ;;  %s1379_s11 = smov 0  }
   0x6 LB: > { %s1010_s12 = sadd.s32 4294967295, %s1349_s11   ;;  %s1011_s13 = sadd.s32 4294967294, %s1349_s11   ;;  %s1349_s11 = sphi %s1379_s11, %s17_s11   ;;  %s1345_s10 = sphi %s1377_s10, %s1641_s10   ;;  %s1341_s9 = sphi %s1375_s9, %s1640_s9   ;;  %s1337_s8 = sphi %s1373_s8, %s1639_s8   ;;  %s1333_s7 = sphi %s1371_s7, %s1638_s7   ;;  %s1329_s6 = sphi %s1369_s6, %s1637_s6  }
   0x7   : > { %s29_s14 = sadd.s32 1, %s1345_s10  ;;  %s38_s15 = sadd.s32 1, %s1337_s8 }
   0x8   : > { %p31_p0 = scmp.ge.s32.totalorder %s29_s14, 2  ;;  %p45_p1 = scmp.ne.s32.totalorder %s1337_s8, %s1333_s7 }
   0x9   : > { %p46_p2 = scmp.eq.s32.totalorder %s1349_s11, 0  ;;  %p51_p3 = scmp.ne.s32.totalorder %s1333_s7, %s1329_s6 }
   0xa   : > { %s1643_s14 = smov (%p31_p0, %s29_s14), 0  ;;  %p52_p5 = scmp.eq.s32.totalorder %s1010_s12, 0 }
   0xb   : > { %p1410_p4 = por %p46_p2, %p45_p1  ;;  %s33_s17 = ssub.s32 %s1345_s10, %s1643_s14 }
   0xc   : > { %p77_p6 = scmp.eq.s32.totalorder %s1010_s12, 1  ;;  %p36_p7 = scmp.eq.s32.totalorder %s33_s17, 0 }
   0xd   : > { %p1416_p8 = por %p52_p5, %p51_p3  ;;  %p83_p10 = scmp.eq.s32.totalorder %s1011_s13, 1 }
   0xe   : > { %p1420_p9 = por %p77_p6, %p45_p1  ;;  %p1185_p13 = scmp.lt.s32.totalorder %s1349_s11, 2 }
   0xf   : > { %s1425_s20 = scalar_select %p36_p7, %s1337_s8, %s38_s15  }
  0x10   : > { %p1427_p11 = por %p83_p10, %p51_p3  ;;  %s103_s22 = sand.u32 1, %s1337_s8  }
  0x11   : > { %s1014_s23 = sshll.u32 %s103_s22, 6  ;;  %s1063_s24 = sshll.u32 %s1345_s10, 10 }
  0x12   : > { %s116_s27 = scalar_lea.hbm %s1625_s0, %s1063_s24  ;;  %s107_s28 = scalar_lea.vmem [#allocation2], %s1014_s23 }
  0x13   : > { %s117_s29 = sshll.u32 %s107_s28, 4  ;;  %p1440_p0 = pnand %p1185_p13, %p1410_p4  ;;  %s118_s29 = int_to_ptr.vmem [resolvable:$true] %s117_s29 }
  0x14   : > { %p1017_p1 = scmp.ge.s32.totalorder %s1349_s11, 1  ;;  %s104_s2 = scalar_lea.sflag [#allocation3], %s103_s22 }
  0x15   : > { %p1243_p2 = pneg %p1440_p0  ;;  %s1254_s3 = scalar_lea.vmem %s118_s29, 1024 }
  0x16   : > { %p1255_p3 = scmp.ne.s32.totalorder %s118_s29, %s1254_s3  ;;  %s1351_s4 = smov [#allocation2]  }
  0x17   : > { %s1259_s5 = sshll.u32 %s1351_s4, 4  ;;  %s1260_s5 = int_to_ptr.vmem [resolvable:$false] %s1259_s5 }
  0x18   : > { %p1257_p5 = pnand %p1255_p3, %p1243_p2  ;;  %s1261_s12 = scalar_lea.vmem %s1260_s5, 2048 }
  0x19   : > { %p1262_p7 = scmp.lt.s32.totalorder %s118_s29, %s1260_s5  ;;  %p1263_p10 = scmp.lt.s32.totalorder %s1261_s12, %s1254_s3 }
  0x1a   : > { %p1258_p6 = pneg %p1257_p5 }
  0x1b   : > { %p1264_p12 = por %p1263_p10, %p1262_p7 }
  0x1d   : > { %p1265_p4 = pnand %p1264_p12, %p1258_p6 }
  0x1f   : > { %1268 = shalt.err (!%p1265_p4)
}
  0x20   : > { %s1352_s13 = smov 128   ;;  %s1353_s15 = smov 8  }
  0x21   : > { %1180 = dma.hbm_to_vmem [thread:$0]  (!%p1440_p0), %s116_s27, 1024, %s118_s29, %s104_s2, %s1352_s13, %s1352_s13, %s1353_s15  }
  0x22   : > { %p125_p13 = scmp.lt.s32.totalorder %s1349_s11, 3 }
  0x24   : > { %p126_p2 = pnand %p1017_p1, %p125_p13 }
  0x25   : > { %s1453_s16 = sand.u32 (!%p126_p2), 1, %s1333_s7  }
  0x26   : > { %129 = sbr.rel (%p126_p2) target bundleno = 480 (0x1e0), region = 24  ;;  %s1018_s17 = sshll.u32 (!%p126_p2), %s1453_s16, 6 }
  0x27   : > { %s132_s22 = scalar_lea.sflag (!%p126_p2), [#allocation3], %s1453_s16  ;;  %s1457_s23 = scalar_lea.vmem (!%p126_p2), [#allocation2], %s1018_s17 }
  0x2b   : > { %1320 = dma.done.wait (%p1416_p8), %s132_s22, 1024  }
  0x2c   : > { %1322 = vsyncadd (%p1416_p8), %s132_s22, 4294966272  ;;  %v164_v0 = vlaneseq  ;;  %vm212_vm0 = vcmask 130048   ;;  %v156_v8 = vld [vmem:[%s1457_s23] sm:$0xff]  ;;  %v158_v9 = vld [vmem:[%s1457_s23 + $0x10] sm:$0xff]  ;;  %v1354_v13 = vmov 1.0   ;;  %v1355_v26 = vmov 0.0  }
  0x2d   : > { %1109 = vmatprep.mubr.msk.f32.mxu0 %vm212_vm0, %v156_v8  ;;  %1116 = vmatprep.mubr.msk.f32.mxu1 %vm212_vm0, %v158_v9  ;;  %v157_v14 = vld [vmem:[%s1457_s23 + $0x8] sm:$0xff]  ;;  %v159_v15 = vld [vmem:[%s1457_s23 + $0x18] sm:$0xff]  ;;  %v160_v16 = vld [vmem:[%s1457_s23 + $0x20] sm:$0xff]  ;;  %s1019_s18 = sshll.u32 %s1453_s16, 7  ;;  %s1064_s25 = sshll.u32 %s1341_s9, 11 }
  0x2e   : > { %v165_v1 = vand.u32 127, %v164_v0  ;;  %v168_v2 = vshrl.u32 %v164_v0, 7  ;;  %v162_v17 = vld [vmem:[%s1457_s23 + $0x30] sm:$0xff]  ;;  %v161_v18 = vld [vmem:[%s1457_s23 + $0x28] sm:$0xff]  ;;  %v163_v19 = vld [vmem:[%s1457_s23 + $0x38] sm:$0xff]  ;;  %s1536_s24 = scalar_lea.vmem [#allocation5], %s1019_s18  ;;  %s1567_s29 = scalar_lea.hbm %s1626_s1, %s1064_s25 }
  0x2f   : > { %s923_s26 = sshll.u32 %s1536_s24, 4  ;;  %s907_s9 = scalar_lea.sflag [#allocation4], %s1453_s16  ;;  %s1569_s26 = int_to_ptr.vmem [resolvable:$true] %s923_s26 }
  0x30   : > { %v166_v3 = vmul.u32 16, %v165_v1  ;;  %v169_v4 = vadd.s32 8, %v168_v2  ;;  %v170_v5 = vmul.u32 32, %v168_v2  ;;  %v184_v24 = vadd.s32 16, %v168_v2  ;;  %s1269_s30 = scalar_lea.vmem %s1569_s26, 2048  ;;  %s1356_s2 = smov [#allocation5]  }
  0x31   : > { %v190_v20 = vmul.u32 32, %v165_v1  ;;  %v186_v21 = vmul.u32 16, %v168_v2  ;;  %v185_v25 = vadd.s32 24, %v168_v2  ;;  %p1270_p8 = scmp.ne.s32.totalorder %s1569_s26, %s1269_s30  ;;  %s1273_s3 = sshll.u32 %s1356_s2, 4  ;;  %s1274_s3 = int_to_ptr.vmem [resolvable:$false] %s1273_s3 }
  0x32   : > { %v171_v6 = vmul.u32 32, %v169_v4  ;;  %v174_v7 = vadd.s32 32, %v170_v5  ;;  %vm172_vm1 = vcmp.le.s32.totalorder %v170_v5, %v166_v3  ;;  %v187_v23 = vmul.u32 16, %v169_v4  ;;  %s1275_s4 = scalar_lea.vmem %s1274_s3, 4096  ;;  %p1276_p1 = scmp.lt.s32.totalorder %s1569_s26, %s1274_s3 }
  0x33   : > { %v195_v22 = vadd.s32 32, %v190_v20  ;;  %vm191_vm7 = vcmp.le.s32.totalorder %v190_v20, %v186_v21  ;;  %v188_v28 = vmul.u32 16, %v184_v24  ;;  %v189_v30 = vmul.u32 16, %v185_v25  ;;  %p1271_p12 = pnand %p1270_p8, %p1420_p9  ;;  %p1277_p3 = scmp.lt.s32.totalorder %s1275_s4, %s1269_s30 }
  0x34   : > { %vm173_vm2 = vcmp.le.s32.totalorder %v171_v6, %v166_v3  ;;  %v175_v10 = vadd.s32 32, %v171_v6  ;;  %vm176_vm3 = vcmp.lt.s32.totalorder %v166_v3, %v174_v7  ;;  %vm192_vm10 = vcmp.le.s32.totalorder %v190_v20, %v187_v23 }
  0x35   : > { %vm1467_vm5 = vmand %vm172_vm1, %vm176_vm3  ;;  %vm196_vm8 = vcmp.lt.s32.totalorder %v186_v21, %v195_v22  ;;  %vm197_vm11 = vcmp.lt.s32.totalorder %v187_v23, %v195_v22  ;;  %vm193_vm13 = vcmp.le.s32.totalorder %v190_v20, %v188_v28  ;;  %vm198_vm14 = vcmp.lt.s32.totalorder %v188_v28, %v195_v22  ;;  %p1272_p0 = pneg %p1271_p12  ;;  %p1278_p5 = por %p1277_p3, %p1276_p1 }
  0x36   : > { %vm177_vm4 = vcmp.lt.s32.totalorder %v166_v3, %v175_v10  ;;  %vm200_vm9 = vmand %vm191_vm7, %vm196_vm8  ;;  %vm194_vm1 = vcmp.le.s32.totalorder %v190_v20, %v189_v30 }
  0x37   : > { %vm1471_vm6 = vmand %vm173_vm2, %vm177_vm4  ;;  %v1022_v27 = vsel %vm200_vm9, 1.0, %v1355_v26  ;;  %vm199_vm2 = vcmp.lt.s32.totalorder %v189_v30, %v195_v22  ;;  %vm889_vm4 = vcmask 261120   ;;  %p1279_p6 = pnand %p1278_p5, %p1272_p0 }
  0x38   : > { %1105 = vmatprep.subr.msk.mxu0 %vm1471_vm6, %v1354_v13  ;;  %1112 = vmatprep.subr.msk.mxu1 %vm1471_vm6, %v1354_v13  ;;  %vm201_vm12 = vmand %vm192_vm10, %vm197_vm11 }
  0x39   : > { %1106 = vmatpush3.msk.msra.mxu0 %vm1471_vm6, %v1354_v13  ;;  %1113 = vmatpush3.msk.msra.mxu1 %vm1471_vm6, %v1354_v13  ;;  %v1023_v29 = vsel %vm201_vm12, 1.0, %v1355_v26  ;;  %vm202_vm15 = vmand %vm193_vm13, %vm198_vm14 }
  0x3a   : > { %1107 = vmatprep.subr.msk.mxu0 %vm1467_vm5, %v1354_v13  ;;  %1114 = vmatprep.subr.msk.mxu1 %vm1467_vm5, %v1354_v13  ;;  %v1024_v31 = vsel %vm202_vm15, 1.0, %v1355_v26  ;;  %vm203_vm3 = vmand %vm194_vm1, %vm199_vm2 }
  0x3b   : > { %1108 = vmatpush3.msk.msra.mxu0 %vm1467_vm5, %v1354_v13  ;;  %1115 = vmatpush3.msk.msra.mxu1 %vm1467_vm5, %v1354_v13  ;;  %v1025_v32 = vsel %vm203_vm3, 1.0, %v1355_v26 }
  0x3c   : > { %1110 = vmatmul.mubr.msk.f32.vlgmr.msra.gmra.mxu0 %vm212_vm0, %v157_v14  ;;  %1117 = vmatmul.mubr.msk.f32.vlgmr.msra.gmra.mxu1 %vm212_vm0, %v159_v15 }
  0x3d   : > { %1119 = vmatprep.subr.msk.mxu0 %vm1471_vm6, %v1354_v13  ;;  %1126 = vmatprep.subr.msk.mxu1 %vm1471_vm6, %v1354_v13 }
  0x3e   : > { %1120 = vmatpush3.msk.msra.mxu0 %vm1471_vm6, %v1354_v13  ;;  %1127 = vmatpush3.msk.msra.mxu1 %vm1471_vm6, %v1354_v13 }
  0x3f   : > { %1121 = vmatprep.subr.msk.mxu0 %vm1467_vm5, %v1354_v13  ;;  %1128 = vmatprep.subr.msk.mxu1 %vm1467_vm5, %v1354_v13 }
  0x40   : > { %1122 = vmatpush3.msk.msra.mxu0 %vm1467_vm5, %v1354_v13  ;;  %1123 = vmatprep.mubr.msk.f32.mxu0 %vm212_vm0, %v160_v16 }
  0x41   : > { %1129 = vmatpush3.msk.msra.mxu1 %vm1467_vm5, %v1354_v13  ;;  %1130 = vmatprep.mubr.msk.f32.mxu1 %vm212_vm0, %v162_v17 }
  0x42   : > { %1124 = vmatmul.mubr.msk.f32.vlgmr.msra.gmra.mxu0 %vm212_vm0, %v161_v18  ;;  %1131 = vmatmul.mubr.msk.f32.vlgmr.msra.gmra.mxu1 %vm212_vm0, %v163_v19 }
  0x43   : > { %1137 = vmatprep.mubr.msk.f32.mxu0 %vm212_vm0, %v1022_v27  ;;  %1147 = vmatprep.mubr.msk.f32.mxu1 %vm212_vm0, %v1022_v27 }
  0xfc   : > { %v1111_v33 = vpop.f32.mrf.mxu0  ;;  %v1118_v34 = vpop.f32.mrf.mxu1 }
  0xfd   : > { %1133 = vmatprep.subr.mxu0 %v1111_v33  ;;  %1143 = vmatprep.subr.mxu1 %v1118_v34 }
  0xfe   : > { %v285_v35 = vpop.f32.mrf.mxu0  ;;  %v366_v36 = vpop.f32.mrf.mxu1  ;;  %1134 = vmatpush3.msra.mxu0 %v1111_v33  ;;  %1144 = vmatpush3.msra.mxu1 %v1118_v34 }
  0xff   : > { %1135 = vmatprep.subr.mxu0 %v285_v35  ;;  %1145 = vmatprep.subr.mxu1 %v366_v36 }
 0x100   : > { %1136 = vmatpush3.msra.mxu0 %v285_v35  ;;  %1146 = vmatpush3.msra.mxu1 %v366_v36 }
 0x101   : > { %1138 = vmatmul.mubr.msk.f32.vlgmr.msra.gmra.mxu0 %vm212_vm0, %v1023_v29  ;;  %1148 = vmatmul.mubr.msk.f32.vlgmr.msra.gmra.mxu1 %vm212_vm0, %v1023_v29 }
 0x102   : > { %v1125_v37 = vpop.f32.mrf.mxu0  ;;  %v1132_v38 = vpop.f32.mrf.mxu1  ;;  %1140 = vmatprep.mubr.msk.f32.mxu0 %vm212_vm0, %v1024_v31  ;;  %1150 = vmatprep.mubr.msk.f32.mxu1 %vm212_vm0, %v1024_v31 }
 0x103   : > { %1153 = vmatprep.subr.mxu0 %v1125_v37  ;;  %1163 = vmatprep.subr.mxu1 %v1132_v38 }
 0x104   : > { %v447_v39 = vpop.f32.mrf.mxu0  ;;  %v528_v40 = vpop.f32.mrf.mxu1  ;;  %1154 = vmatpush3.msra.mxu0 %v1125_v37  ;;  %1164 = vmatpush3.msra.mxu1 %v1132_v38 }
 0x105   : > { %1155 = vmatprep.subr.mxu0 %v447_v39  ;;  %1165 = vmatprep.subr.mxu1 %v528_v40 }
 0x106   : > { %1156 = vmatpush3.msra.mxu0 %v447_v39  ;;  %1166 = vmatpush3.msra.mxu1 %v528_v40 }
 0x107   : > { %1141 = vmatmul.mubr.msk.f32.gmra.mxu0 %vm212_vm0, %v1025_v32  ;;  %1151 = vmatmul.mubr.msk.f32.gmra.mxu1 %vm212_vm0, %v1025_v32 }
 0x108   : > { %1157 = vmatprep.mubr.msk.f32.mxu0 %vm212_vm0, %v1022_v27  ;;  %1167 = vmatprep.mubr.msk.f32.mxu1 %vm212_vm0, %v1022_v27 }
 0x10b   : > { %1158 = vmatmul.mubr.msk.f32.vlgmr.msra.gmra.mxu0 %vm212_vm0, %v1023_v29  ;;  %1168 = vmatmul.mubr.msk.f32.vlgmr.msra.gmra.mxu1 %vm212_vm0, %v1023_v29 }
 0x10c   : > { %1160 = vmatprep.mubr.msk.f32.mxu0 %vm212_vm0, %v1024_v31  ;;  %1170 = vmatprep.mubr.msk.f32.mxu1 %vm212_vm0, %v1024_v31 }
 0x10f   : > { %1161 = vmatmul.mubr.msk.f32.gmra.mxu0 %vm212_vm0, %v1025_v32  ;;  %1171 = vmatmul.mubr.msk.f32.gmra.mxu1 %vm212_vm0, %v1025_v32 }
 0x1c1   : > { %v1139_v41 = vpop.f32.mrf.mxu0  ;;  %v1149_v42 = vpop.f32.mrf.mxu1 }
 0x1c2   : > { %891 = vst.msk [vmem:[%s1536_s24 + $0x8] sm:$0xff] %vm889_vm4, %v1139_v41  ;;  %895 = vst.msk [vmem:[%s1536_s24 + $0x28] sm:$0xff] %vm889_vm4, %v1149_v42 }
 0x1c3   : > { %v615_v43 = vpop.f32.mrf.mxu0  ;;  %v700_v44 = vpop.f32.mrf.mxu1 }
 0x1c4   : > { %890 = vst.msk [vmem:[%s1536_s24] sm:$0xff] %vm889_vm4, %v615_v43  ;;  %894 = vst.msk [vmem:[%s1536_s24 + $0x20] sm:$0xff] %vm889_vm4, %v700_v44 }
 0x1c7   : > { %v1142_v45 = vpop.f32.mrf.mxu0  ;;  %v1152_v46 = vpop.f32.mrf.mxu1 }
 0x1c8   : > { %893 = vst.msk [vmem:[%s1536_s24 + $0x18] sm:$0xff] %vm889_vm4, %v1142_v45  ;;  %897 = vst.msk [vmem:[%s1536_s24 + $0x38] sm:$0xff] %vm889_vm4, %v1152_v46 }
 0x1c9   : > { %v625_v47 = vpop.f32.mrf.mxu0  ;;  %v710_v48 = vpop.f32.mrf.mxu1 }
 0x1ca   : > { %892 = vst.msk [vmem:[%s1536_s24 + $0x10] sm:$0xff] %vm889_vm4, %v625_v47  ;;  %896 = vst.msk [vmem:[%s1536_s24 + $0x30] sm:$0xff] %vm889_vm4, %v710_v48 }
 0x1cb   : > { %v1159_v49 = vpop.f32.mrf.mxu0  ;;  %v1169_v50 = vpop.f32.mrf.mxu1 }
 0x1cc   : > { %899 = vst.msk [vmem:[%s1536_s24 + $0x48] sm:$0xff] %vm889_vm4, %v1159_v49  ;;  %903 = vst.msk [vmem:[%s1536_s24 + $0x68] sm:$0xff] %vm889_vm4, %v1169_v50 }
 0x1cd   : > { %v785_v51 = vpop.f32.mrf.mxu0  ;;  %v870_v52 = vpop.f32.mrf.mxu1 }
 0x1ce   : > { %898 = vst.msk [vmem:[%s1536_s24 + $0x40] sm:$0xff] %vm889_vm4, %v785_v51  ;;  %902 = vst.msk [vmem:[%s1536_s24 + $0x60] sm:$0xff] %vm889_vm4, %v870_v52 }
 0x1cf   : > { %v1162_v53 = vpop.f32.mrf.mxu0  ;;  %v1172_v54 = vpop.f32.mrf.mxu1 }
 0x1d0   : > { %901 = vst.msk [vmem:[%s1536_s24 + $0x58] sm:$0xff] %vm889_vm4, %v1162_v53  ;;  %905 = vst.msk [vmem:[%s1536_s24 + $0x78] sm:$0xff] %vm889_vm4, %v1172_v54 }
 0x1d1   : > { %v795_v55 = vpop.f32.mrf.mxu0  ;;  %v880_v56 = vpop.f32.mrf.mxu1 }
 0x1d2   : > { %900 = vst.msk [vmem:[%s1536_s24 + $0x50] sm:$0xff] %vm889_vm4, %v795_v55  ;;  %904 = vst.msk [vmem:[%s1536_s24 + $0x70] sm:$0xff] %vm889_vm4, %v880_v56 }
 0x1d3   : > { %1282 = shalt.err (!%p1279_p6)
}
 0x1d4   : > { %s1283_s5 = scalar_lea.hbm %s1567_s29, 2048  ;;  %s1287_s15 = scalar_lea.hbm %s1626_s1, 4096 }
 0x1d5   : > { %p1284_p7 = scmp.ne.s32.totalorder %s1567_s29, %s1283_s5  ;;  %p1288_p13 = scmp.lt.s32.totalorder %s1567_s29, %s1626_s1 }
 0x1d6   : > { %p1289_p2 = scmp.lt.s32.totalorder %s1287_s15, %s1283_s5 }
 0x1d7   : > { %p1285_p10 = pnand %p1284_p7, %p1420_p9 }
 0x1d8   : > { %p1290_p8 = por %p1289_p2, %p1288_p13 }
 0x1d9   : > { %p1286_p4 = pneg %p1285_p10 }
 0x1db   : > { %p1291_p12 = pnand %p1290_p8, %p1286_p4 }
 0x1dd   : > { %1294 = shalt.err (!%p1291_p12)
}
 0x1de   : > { %s1357_s23 = smov 128   ;;  %s1358_s18 = smov 8  }
 0x1df   : > { %1175 = dma.vmem_to_hbm [thread:$0]  (%p1420_p9), %s1569_s26, 2048, %s1567_s29, %s907_s9, %s1357_s23, %s1357_s23, %s1358_s18  }
 0x1e0 PF: > { %s938_s24 = sand.u32 1, %s1329_s6   ;;  %p1636_p0 = scmp.ge.s32.totalorder %s1349_s11, 2 }
 0x1e1   : > { %s939_s25 = scalar_lea.sflag [#allocation4], %s938_s24 }
 0x1e2   : > { %p1182_p1 = pnand %p1636_p0, %p1427_p11 }
 0x1e4   : > { %p1183_p3 = pneg %p1182_p1 }
 0x1e6   : > { %1324 = dma.done.wait (%p1183_p3), %s939_s25, 2048  }
 0x1e7   : > { %1326 = vsyncadd (%p1183_p3), %s939_s25, 4294965248  ;;  %s17_s11 = sadd.s32 1, %s1349_s11   ;;  %s1637_s6 = smov %s1333_s7 }
 0x1e8   : > { %p14_p5 = scmp.ge.s32.totalorder %s17_s11, 4   ;;  %s1638_s7 = smov %s1337_s8 }
 0x1e9   : > { %s1639_s8 = smov %s1425_s20  ;;  %s1640_s9 = smov %s1345_s10 }
 0x1ea   : > { %s1641_s10 = smov %s1643_s14  ;;  %16 = sbr.rel (!%p14_p5) target bundleno = 6 (0x6), region = 69 }
 0x1ef   :  { %944 = vsyncpa [#allocation3], 1 }
 0x1f0   :  { %946 = vsyncpa [#allocation3 + $0x1], 1 }
 0x1f1   :  { %947 = vsyncpa [#allocation4], 1 }
 0x1f2   :  { %949 = vsyncpa [#allocation4 + $0x1], 1 }

</bundles_post_ra>
